<compile_context>
chip_gen: v5e
topology: v5e:2x2
jax: 0.10.0
libtpu: 0.0.40
codegen_flags: <defaults>
</compile_context>

<pallas_src>
import functools
import math

import jax
import jax.numpy as jnp
from jax.experimental import pallas as pl
from jax.experimental.pallas import tpu as pltpu


def _label_smoothing_kernel(x_ref, tgt_ref, o_ref, *, size, padding_idx,
                            smoothing, row_tile, n_rows, fused_log_softmax):
    """Writes this row-tile's partial KLDiv sum, broadcast over an (8,128) block."""
    confidence = 1.0 - smoothing
    smooth_val = (smoothing / (size - 2)) if smoothing > 0.0 else 0.0
    log_conf = math.log(confidence) if confidence > 0.0 else 0.0
    log_smooth = math.log(smooth_val) if smooth_val > 0.0 else 0.0
    # sum_j td[j]*log(td[j]) for any valid (non-padding) row: a compile-time const.
    row_const = confidence * log_conf + (size - 2) * smooth_val * log_smooth

    x = x_ref[...].astype(jnp.float32)          # (TN, V) in HBM dtype, f32 math
    tgt = tgt_ref[...]                          # (TN, 1) int32 labels
    tn, v = x.shape

    col = jax.lax.broadcasted_iota(jnp.int32, (1, v), 1)
    is_tgt = col == tgt                         # (TN, V)

    raw_sum = jnp.sum(x, axis=1, keepdims=True)                          # (TN,1)
    raw_tgt = jnp.sum(jnp.where(is_tgt, x, 0.0), axis=1, keepdims=True)  # (TN,1)
    raw_pad = x[:, padding_idx:padding_idx + 1]                          # (TN,1)

    if fused_log_softmax:
        m = jnp.max(x, axis=1, keepdims=True)
        lse = m + jnp.log(jnp.sum(jnp.exp(x - m), axis=1, keepdims=True))
        x_sum = raw_sum - v * lse
        x_tgt = raw_tgt - lse
        x_pad = raw_pad - lse
    else:
        x_sum, x_tgt, x_pad = raw_sum, raw_tgt, raw_pad

    # loss_row = sum_j td*log(td) - sum_j td*x   (td nonzero only off the
    # padding column; padding rows are masked out below).
    loss_rows = (row_const
                 - confidence * x_tgt
                 - smooth_val * (x_sum - x_tgt - x_pad))

    # Mask padding-target rows and the garbage rows of a remainder block.
    row = jax.lax.broadcasted_iota(jnp.int32, (tn, 1), 0)
    global_row = row + pl.program_id(0) * row_tile
    row_valid = (global_row < n_rows) & (tgt != padding_idx)

    total = jnp.sum(jnp.where(row_valid, loss_rows, 0.0))
    # Lane-dense output: one unmasked vst per grid step.
    o_ref[...] = jnp.broadcast_to(total, o_ref.shape)


def label_smoothing_loss(x, target, *, size, padding_idx, smoothing,
                         inputs_are_logits=False, max_row_tile=4096):
    """Scalar sum-KLDiv loss matching LabelSmoothing.forward.

    x: (N, V) log-probabilities (or raw logits if inputs_are_logits=True, in
       which case log_softmax is fused into the kernel).
    target: (N,) integer class ids.
    """
    N, V = x.shape
    assert V == size
    if smoothing > 0.0:
        assert size > 2, "smoothing/(size-2) is undefined for size <= 2"

    # --- VMEM budget (v7x has 64 MiB/TC; v5e/v6e have 128 MiB) -------------
    try:
        vmem_cap = int(pltpu.get_tpu_info().vmem_capacity_bytes)
    except Exception:
        vmem_cap = 64 * 1024 * 1024          # conservative fallback
    vmem_limit = (64 if vmem_cap >= 100 * 1024 * 1024 else 40) * 1024 * 1024

    # Per-element working set inside the kernel (f32 cast + target mask +
    # masked copy) plus the double-buffered input block; exp temps if fused.
    work_bytes = 12 + 2 * x.dtype.itemsize + (8 if inputs_are_logits else 0)
    max_elems = max(1, (vmem_limit * 3 // 5) // work_bytes)

    if N * V <= max_elems and N <= max_row_tile:
        row_tile = N                         # single full-dim block (rule waived)
    else:
        row_tile = max(8, min(max_row_tile, max_elems // V))
        row_tile = (row_tile // 8) * 8
        row_tile = min(row_tile, max(8, (N // 8) * 8))
        # TODO(synk): add a vocab-axis grid dimension (additive partials) when
        # even an 8-row block exceeds the VMEM budget (multi-million-class V).

    num_tiles = -(-N // row_tile)
    tgt2d = target.reshape(N, 1).astype(jnp.int32)

    kernel = functools.partial(
        _label_smoothing_kernel, size=size, padding_idx=padding_idx,
        smoothing=smoothing, row_tile=row_tile, n_rows=N,
        fused_log_softmax=inputs_are_logits)

    partials = pl.pallas_call(
        kernel,
        out_shape=jax.ShapeDtypeStruct((num_tiles, 8, 128), jnp.float32),
        grid_spec=pltpu.PrefetchScalarGridSpec(
            num_scalar_prefetch=0,
            grid=(num_tiles,),
            in_specs=[
                pl.BlockSpec((row_tile, V), lambda i: (i, 0)),
                pl.BlockSpec((row_tile, 1), lambda i: (i, 0)),
            ],
            out_specs=pl.BlockSpec((1, 8, 128), lambda i: (i, 0, 0)),
        ),
        compiler_params=pltpu.CompilerParams(
            dimension_semantics=("parallel",),
            vmem_limit_bytes=vmem_limit),
    )(x, tgt2d)

    # Every element of a tile's (8,128) block holds that tile's partial sum;
    # pick one per tile and reduce (num_tiles f32 values -- negligible).
    return jnp.sum(partials[:, 0, 0])


def _reference(x_logprobs, target, *, size, padding_idx, smoothing):
    """Pure-JAX reference mirroring the PyTorch module."""
    confidence = 1.0 - smoothing
    smooth_val = smoothing / (size - 2) if smoothing > 0.0 else 0.0
    td = jnp.full(x_logprobs.shape, smooth_val, jnp.float32)
    td = td.at[jnp.arange(x_logprobs.shape[0]), target].set(confidence)
    td = td.at[:, padding_idx].set(0.0)
    td = jnp.where((target == padding_idx)[:, None], 0.0, td)
    safe_log = jnp.log(jnp.where(td > 0, td, 1.0))
    return jnp.sum(jnp.where(td > 0,
                             td * (safe_log - x_logprobs.astype(jnp.float32)),
                             0.0))


if __name__ == "__main__":
    SIZE = 32          # vocab size (x.size(1))
    PADDING_IDX = 0
    SMOOTHING = 0.1
    N = 16             # flattened batch * seq positions

    key = jax.random.PRNGKey(0)
    kx, kt = jax.random.split(key)
    logits = jax.random.normal(kx, (N, SIZE), dtype=jnp.float32)
    x = jax.nn.log_softmax(logits, axis=-1)     # KLDivLoss expects log-probs
    target = jax.random.randint(kt, (N,), 0, SIZE, dtype=jnp.int32)
    # make sure some rows are padding to exercise the row-masking path
    target = target.at[3].set(PADDING_IDX).at[11].set(PADDING_IDX)

    ref = _reference(x, target, size=SIZE, padding_idx=PADDING_IDX,
                     smoothing=SMOOTHING)

    # 1) module semantics: x are log-probabilities.
    loss = label_smoothing_loss(x, target, size=SIZE, padding_idx=PADDING_IDX,
                                smoothing=SMOOTHING)
    loss = jax.block_until_ready(loss)
    assert jnp.allclose(loss, ref, rtol=1e-5, atol=1e-5), (loss, ref)

    # 2) fused path: raw logits in, log_softmax applied inside the kernel.
    loss_fused = label_smoothing_loss(logits, target, size=SIZE,
                                      padding_idx=PADDING_IDX,
                                      smoothing=SMOOTHING,
                                      inputs_are_logits=True)
    loss_fused = jax.block_until_ready(loss_fused)
    assert jnp.allclose(loss_fused, ref, rtol=1e-5, atol=1e-5), (loss_fused, ref)

    # 3) multi-tile grid with a remainder block (exercises row-index masking).
    N2 = 20
    kx2, kt2 = jax.random.split(jax.random.PRNGKey(1))
    x2 = jax.nn.log_softmax(jax.random.normal(kx2, (N2, SIZE), jnp.float32), -1)
    t2 = jax.random.randint(kt2, (N2,), 0, SIZE, dtype=jnp.int32)
    t2 = t2.at[5].set(PADDING_IDX)
    ref2 = _reference(x2, t2, size=SIZE, padding_idx=PADDING_IDX,
                      smoothing=SMOOTHING)
    loss2 = label_smoothing_loss(x2, t2, size=SIZE, padding_idx=PADDING_IDX,
                                 smoothing=SMOOTHING, max_row_tile=8)
    loss2 = jax.block_until_ready(loss2)
    assert jnp.allclose(loss2, ref2, rtol=1e-5, atol=1e-5), (loss2, ref2)

    print("KERNEL_OK")
</pallas_src>

<mosaic_0001>
module attributes {stable_mosaic.version = 11 : i64} {
  func.func @_label_smoothing_kernel(%arg0: i32, %arg1: memref<16x32xf32, #tpu.memory_space<vmem>>, %arg2: memref<16x1xi32, #tpu.memory_space<vmem>>, %arg3: memref<1x8x128xf32, #tpu.memory_space<vmem>>) attributes {dimension_semantics = [#tpu.dimension_semantics<parallel>], iteration_bounds = array<i64: 1>, scalar_prefetch = 0 : i64, scratch_operands = 0 : i64, tpu.core_type = #tpu.core_type<tc>, window_params = [{transform_indices = @transform_0, window_bounds = array<i64: 16, 32>}, {transform_indices = @transform_1, window_bounds = array<i64: 16, 1>}, {transform_indices = @transform_2, window_bounds = array<i64: 1, 8, 128>}]} {
    %c0 = arith.constant 0 : index
    %c0_0 = arith.constant 0 : index
    %0 = vector.load %arg1[%c0, %c0_0] : memref<16x32xf32, #tpu.memory_space<vmem>>, vector<16x32xf32>
    %c0_1 = arith.constant 0 : index
    %c0_2 = arith.constant 0 : index
    %1 = vector.load %arg2[%c0_1, %c0_2] : memref<16x1xi32, #tpu.memory_space<vmem>>, vector<16x1xi32>
    %2 = tpu.iota {dimensions = array<i32: 1>} : vector<1x32xi32>
    %3 = vector.broadcast %2 : vector<1x32xi32> to vector<16x32xi32>
    %4 = vector.broadcast %1 : vector<16x1xi32> to vector<16x32xi32>
    %5 = arith.cmpi eq, %3, %4 : vector<16x32xi32>
    %cst = arith.constant dense<0.000000e+00> : vector<16xf32>
    %6 = vector.multi_reduction <add>, %0, %cst [1] : vector<16x32xf32> to vector<16xf32>
    %7 = vector.shape_cast %6 : vector<16xf32> to vector<16x1xf32>
    %cst_3 = arith.constant 0.000000e+00 : f32
    %8 = vector.broadcast %cst_3 : f32 to vector<16x32xf32>
    %9 = arith.select %5, %0, %8 : vector<16x32xi1>, vector<16x32xf32>
    %cst_4 = arith.constant dense<0.000000e+00> : vector<16xf32>
    %10 = vector.multi_reduction <add>, %9, %cst_4 [1] : vector<16x32xf32> to vector<16xf32>
    %11 = vector.shape_cast %10 : vector<16xf32> to vector<16x1xf32>
    %12 = vector.extract_strided_slice %0 {offsets = [0, 0], sizes = [16, 1], strides = [1, 1]} : vector<16x32xf32> to vector<16x1xf32>
    %cst_5 = arith.constant 0.899999976 : f32
    %13 = vector.broadcast %cst_5 : f32 to vector<16x1xf32>
    %14 = arith.mulf %13, %11 : vector<16x1xf32>
    %cst_6 = arith.constant -0.665202737 : f32
    %15 = vector.broadcast %cst_6 : f32 to vector<16x1xf32>
    %16 = arith.subf %15, %14 : vector<16x1xf32>
    %17 = arith.subf %7, %11 : vector<16x1xf32>
    %18 = arith.subf %17, %12 : vector<16x1xf32>
    %cst_7 = arith.constant 0.00333333341 : f32
    %19 = vector.broadcast %cst_7 : f32 to vector<16x1xf32>
    %20 = arith.mulf %19, %18 : vector<16x1xf32>
    %21 = arith.subf %16, %20 : vector<16x1xf32>
    %22 = tpu.iota {dimensions = array<i32: 0>} : vector<16x1xi32>
    %c16_i32 = arith.constant 16 : i32
    %23 = arith.muli %arg0, %c16_i32 : i32
    %24 = vector.broadcast %23 : i32 to vector<16x1xi32>
    %25 = arith.addi %22, %24 : vector<16x1xi32>
    %c16_i32_8 = arith.constant 16 : i32
    %26 = vector.broadcast %c16_i32_8 : i32 to vector<16x1xi32>
    %27 = arith.cmpi slt, %25, %26 : vector<16x1xi32>
    %c0_i32 = arith.constant 0 : i32
    %28 = vector.broadcast %c0_i32 : i32 to vector<16x1xi32>
    %29 = arith.cmpi ne, %1, %28 : vector<16x1xi32>
    %30 = arith.andi %27, %29 : vector<16x1xi1>
    %cst_9 = arith.constant 0.000000e+00 : f32
    %31 = vector.broadcast %cst_9 : f32 to vector<16x1xf32>
    %32 = arith.select %30, %21, %31 : vector<16x1xi1>, vector<16x1xf32>
    %33 = vector.shape_cast %32 : vector<16x1xf32> to vector<1x16x1xf32>
    %cst_10 = arith.constant dense<0.000000e+00> : vector<1xf32>
    %34 = vector.multi_reduction <add>, %33, %cst_10 [1, 2] : vector<1x16x1xf32> to vector<1xf32>
    %35 = vector.shape_cast %34 : vector<1xf32> to vector<1x1x1xf32>
    %36 = vector.extract %35[0, 0, 0] : f32 from vector<1x1x1xf32>
    %37 = vector.broadcast %36 : f32 to vector<1x8x128xf32>
    %c0_11 = arith.constant 0 : index
    %c0_12 = arith.constant 0 : index
    %c0_13 = arith.constant 0 : index
    %38 = vector.load %arg3[%c0_11, %c0_12, %c0_13] : memref<1x8x128xf32, #tpu.memory_space<vmem>>, vector<1x8x128xf32>
    tpu.vector_store %arg3[%c0_11, %c0_12, %c0_13], %37 {strides = array<i32>} : memref<1x8x128xf32, #tpu.memory_space<vmem>>, vector<1x8x128xf32>,
    return
  }
  func.func @transform_0(%arg0: i32) -> (i32, i32) {
    %c0_i32 = arith.constant 0 : i32
    %c0_i32_0 = arith.constant 0 : i32
    return %arg0, %c0_i32 : i32, i32
  }
  func.func @transform_1(%arg0: i32) -> (i32, i32) {
    %c0_i32 = arith.constant 0 : i32
    %c0_i32_0 = arith.constant 0 : i32
    return %arg0, %c0_i32 : i32, i32
  }
  func.func @transform_2(%arg0: i32) -> (i32, i32, i32) {
    %c0_i32 = arith.constant 0 : i32
    %c0_i32_0 = arith.constant 0 : i32
    %c0_i32_1 = arith.constant 0 : i32
    return %arg0, %c0_i32, %c0_i32_0 : i32, i32, i32
  }
}

</mosaic_0001>

<bundles_post_ra>
// kernel: tpu_custom_call.1
= control target key start
LH: loop header
LB: loop body
LE: loop exit
PB: predicated region body
PF: predicated region fallthrough
CT: control target
= control target key end

     0   :  { %s166_s0 = inlined_call_operand.vmem [shape: f32[16,32], index: 0, kind: input, shape index: {}]   ;;  %s167_s1 = inlined_call_operand.vmem [shape: s32[16,1], index: 1, kind: input, shape index: {}]   ;;  %s168_s2 = inlined_call_operand.hbm [shape: f32[1,8,128], index: 2, kind: output, shape index: {}]  }
   0x1   :  { %v14_v0 = vld [vmem:[%s167_s1] sm:$0xff] }
   0x2   :  { %7 = vsyncpa [#allocation3], 0  ;;  %v130_v1 = vmov 0   ;;  %v15_v2 = vld [vmem:[%s167_s1 + $0x8] sm:$0xff]  ;;  %v12_v3 = vld [vmem:[%s166_s0] sm:$0xff]  ;;  %vm26_vm0 = vcmask 261120   ;;  %v16_v7 = vlaneseq }
   0x3   :  { %103 = vset.pattern.permute.xlu0 %v130_v1  ;;  %v27_v4 = vsel %vm26_vm0, %v12_v3, 0.0  ;;  %v13_v5 = vld [vmem:[%s166_s0 + $0x8] sm:$0xff]  ;;  %vm62_vm3 = vcmp.ne.s32.totalorder %v14_v0, 0  ;;  %vm63_vm4 = vcmp.ne.s32.totalorder %v15_v2, 0  ;;  %vm68_vm5 = vcmask 7168   ;;  %s131_s0 = smov [#allocation2]  }
   0x4   :  { %19 = vperm.xlu0 %103, %v14_v0   ;;  %28 = vadd.xlane.f32.xlu1 %v27_v4  ;;  %v30_v6 = vsel %vm26_vm0, %v13_v5, 0.0  ;;  %v17_v8 = vand.u32 127, %v16_v7  ;;  %s88_s1 = sshll.u32 %s131_s0, 4  ;;  %s90_s19 = sshll.u32 %s168_s2, 4  ;;  %s89_s1 = int_to_ptr.vmem [resolvable:$true] %s88_s1  ;;  %s91_s19 = int_to_ptr.hbm [resolvable:$true] %s90_s19 }
   0xc   :  { %22 = vperm.xlu0 %103, %v15_v2   ;;  %31 = vadd.xlane.f32.xlu1 %v30_v6 }
  0x76   :  { %v20_v9 = vpop.permute.xlu0 %19 }
  0x77   :  { %vm24_vm1 = vcmp.eq.s32.totalorder %v17_v8, %v20_v9  ;;  %v29_v15 = vpop.xlane.xlu1 %28 }
  0x78   :  { %v33_v10 = vsel %vm24_vm1, %v12_v3, 0.0 }
  0x79   :  { %v35_v11 = vsel %vm26_vm0, %v33_v10, 0.0 }
  0x7a   :  { %36 = vadd.xlane.f32.xlu2 %v35_v11 }
  0x7e   :  { %v23_v12 = vpop.permute.xlu0 %22 }
  0x7f   :  { %vm25_vm2 = vcmp.eq.s32.totalorder %v17_v8, %v23_v12  ;;  %v32_v20 = vpop.xlane.xlu1 %31 }
  0x80   :  { %v34_v13 = vsel %vm25_vm2, %v13_v5, 0.0 }
  0x81   :  { %v38_v14 = vsel %vm26_vm0, %v34_v13, 0.0 }
  0x82   :  { %39 = vadd.xlane.f32.xlu2 %v38_v14 }
  0xed   :  { %v37_v16 = vpop.xlane.xlu2 %36 }
  0xee   :  { %v45_v17 = vsub.f32 %v29_v15, %v37_v16  ;;  %v41_v19 = vmul.f32 0.9, %v37_v16 }
  0xf0   :  { %v47_v18 = vsub.f32 %v45_v17, %v12_v3  ;;  %v43_v23 = vsub.f32 -0.66520274, %v41_v19 }
  0xf2   :  { %v49_v21 = vmul.f32 0.0033333334, %v47_v18 }
  0xf4   :  { %v51_v26 = vsub.f32 %v43_v23, %v49_v21 }
  0xf5   :  { %v40_v22 = vpop.xlane.xlu2 %39 }
  0xf6   :  { %v42_v24 = vmul.f32 0.9, %v40_v22  ;;  %v46_v25 = vsub.f32 %v32_v20, %v40_v22  ;;  %v66_v31 = vsel %vm62_vm3, %v51_v26, 0.0 }
  0xf7   :  { %v69_v33 = vsel %vm68_vm5, %v66_v31, 0.0 }
  0xf8   :  { %v48_v27 = vsub.f32 %v46_v25, %v13_v5  ;;  %v44_v28 = vsub.f32 -0.66520274, %v42_v24 }
  0xfa   :  { %v50_v29 = vmul.f32 0.0033333334, %v48_v27 }
  0xfc   :  { %v52_v30 = vsub.f32 %v44_v28, %v50_v29 }
  0xfe   :  { %v67_v32 = vsel %vm63_vm4, %v52_v30, 0.0 }
  0xff   :  { %v70_v34 = vsel %vm68_vm5, %v67_v32, 0.0 }
 0x100   :  { %v71_v35 = vadd.f32 %v70_v34, %v69_v33 }
 0x102   :  { %72 = vadd.xlane.f32.xlu0 %v71_v35 }
 0x175   :  { %v73_v36 = vpop.xlane.xlu0 %72 }
 0x176   :  { %v74_v37 = vrot.slane %v73_v36, 4 }
 0x178   :  { %v75_v38 = vadd.f32 %v74_v37, %v73_v36 }
 0x17a   :  { %v76_v39 = vrot.slane %v75_v38, 2 }
 0x17c   :  { %v77_v40 = vadd.f32 %v76_v39, %v75_v38 }
 0x17e   :  { %v78_v41 = vrot.slane %v77_v40, 1 }
 0x180   :  { %v79_v42 = vadd.f32 %v78_v41, %v77_v40 }
 0x182   :  { %99 = vpush %v79_v42 }
 0x1b3   :  { %s100_s20 = spop %99 }
 0x1b4   :  { %v81_v43 = vstv %s100_s20 }
 0x1b5   :  { %82 = vst [vmem:[#allocation2] sm:$0xff] %v81_v43 }
 0x1b6   :  { %93 = dma.vmem_to_hbm [thread:$0]  %s89_s1, 128, %s91_s19, [#allocation3]  }
 0x1b7   :  { %128 = dma.done.wait [#allocation3], 128  }
 0x1b8   :  { %129 = vsyncadd [#allocation3], 4294967168 }
 0x1b9   :  { %98 = vsyncpa [#allocation3], 1 }

</bundles_post_ra>
